<compile_context>
chip_gen: v7x
topology: tpu7x:2x2x1
jax: 0.10.0
libtpu: 0.0.40
codegen_flags: <defaults>
</compile_context>

<pallas_src>
import functools

import jax
import jax.numpy as jnp
from jax.experimental import pallas as pl
from jax.experimental.pallas import tpu as pltpu


def finetuner_kernel(x_ref, w1_ref, b1_ref, w2_ref, b2_ref, out_ref):
    # embedder: h = relu(x @ W1 + b1)   (bf16 MXU inputs, f32 accumulation)
    h = jnp.dot(x_ref[...], w1_ref[...], preferred_element_type=jnp.float32)
    h = jnp.maximum(h + b1_ref[...], 0.0)
    # clf: y_hat = h @ W2 + b2          (h cast to bf16 only at the dot input)
    y = jnp.dot(h.astype(jnp.bfloat16), w2_ref[...],
                preferred_element_type=jnp.float32)
    out_ref[...] = (y + b2_ref[...]).astype(out_ref.dtype)


def _round_up(n, m):
    return ((n + m - 1) // m) * m


def prepare_finetuner_params(w1, b1, w2, b2):
    """One-time pad + bf16 cast of the parameters (hoisted out of the per-call
    path).  Only the output dims (hidden / num_classes) are lane-padded to
    128; the contraction dim (in_features) is left unpadded.  Zero padding is
    exact: padded W1 cols / b1 entries give relu(0)=0 hidden columns, which
    contribute nothing through the zero-padded W2 rows; padded output columns
    are sliced off in the wrapper."""
    in_features, hidden = w1.shape
    num_classes = w2.shape[1]
    hid_p = _round_up(hidden, 128)
    ncls_p = _round_up(num_classes, 128)

    w1p = jnp.zeros((in_features, hid_p), jnp.bfloat16)
    w1p = w1p.at[:, :hidden].set(w1.astype(jnp.bfloat16))
    b1p = jnp.zeros((1, hid_p), jnp.float32)
    b1p = b1p.at[:, :hidden].set(b1.reshape(1, -1).astype(jnp.float32))
    w2p = jnp.zeros((hid_p, ncls_p), jnp.bfloat16)
    w2p = w2p.at[:hidden, :num_classes].set(w2.astype(jnp.bfloat16))
    b2p = jnp.zeros((1, ncls_p), jnp.float32)
    b2p = b2p.at[:, :num_classes].set(b2.reshape(1, -1).astype(jnp.float32))
    return w1p, b1p, w2p, b2p


def _pick_tile_m(batch, target=512):
    """Adaptive batch tile: large enough to amortize per-grid-step overhead,
    small enough to bound batch padding waste, and (when the batch allows)
    >= 2 grid steps so v7x's two TensorCores both get work."""
    bp8 = _round_up(batch, 8)
    if bp8 >= 2 * target:
        return target
    return max(_round_up((bp8 + 1) // 2, 8), 8)


@functools.partial(jax.jit, static_argnames=("num_classes", "tile_m"))
def finetuner_forward(x, w1p, b1p, w2p, b2p, *, num_classes, tile_m=None):
    batch, in_features = x.shape
    hid_p = w1p.shape[1]
    ncls_p = w2p.shape[1]

    if tile_m is None:
        tile_m = _pick_tile_m(batch)
    batch_p = _round_up(batch, tile_m)

    # Per-call wrapper work: only the x bf16 cast + batch-row pad (no K pad).
    xp = jnp.zeros((batch_p, in_features), jnp.bfloat16)
    xp = xp.at[:batch, :].set(x.astype(jnp.bfloat16))

    grid = (batch_p // tile_m,)

    # VMEM budget: double-buffered x / out tiles, single-buffered resident
    # weights (Buffered(1)), biases, plus the f32 h intermediate.  2x margin.
    needed = (2 * tile_m * in_features * 2      # x tiles   (bf16, 2 buffers)
              + 2 * tile_m * ncls_p * 2         # out tiles (bf16, 2 buffers)
              + in_features * hid_p * 2         # W1        (bf16, 1 buffer)
              + hid_p * ncls_p * 2              # W2        (bf16, 1 buffer)
              + (hid_p + ncls_p) * 4            # biases    (f32)
              + tile_m * hid_p * 4)             # h intermediate (f32)
    vmem_limit = int(min(max(2 * needed, 32 << 20), 64 << 20))

    def resident_spec(shape):
        # Invariant block index -> VMEM-resident, single buffer.
        return pl.BlockSpec(shape, lambda i: (0, 0),
                            pipeline_mode=pl.Buffered(1))

    out_p = pl.pallas_call(
        finetuner_kernel,
        out_shape=jax.ShapeDtypeStruct((batch_p, ncls_p), jnp.bfloat16),
        grid=grid,
        in_specs=[
            # x: one batch tile per grid step (double-buffered by the pipeline).
            pl.BlockSpec((tile_m, in_features), lambda i: (i, 0)),
            resident_spec((in_features, hid_p)),
            resident_spec((1, hid_p)),
            resident_spec((hid_p, ncls_p)),
            resident_spec((1, ncls_p)),
        ],
        out_specs=pl.BlockSpec((tile_m, ncls_p), lambda i: (i, 0)),
        compiler_params=pltpu.CompilerParams(
            dimension_semantics=("parallel",),
            vmem_limit_bytes=vmem_limit,
        ),
    )(xp, w1p, b1p, w2p, b2p)

    # Strip batch / class padding; return f32 logits (bf16 is only the HBM
    # writeback format).
    return out_p[:batch, :num_classes].astype(jnp.float32)


if __name__ == "__main__":
    # Small but multi-tile shapes consistent with the module.
    batch, in_features, hidden, num_classes = 200, 32, 64, 8

    key = jax.random.PRNGKey(0)
    kx, kw1, kb1, kw2, kb2 = jax.random.split(key, 5)

    x = jax.random.normal(kx, (batch, in_features), dtype=jnp.float32)
    # Deterministic synthetic parameters (no checkpoint load).
    w1 = jax.random.normal(kw1, (in_features, hidden), dtype=jnp.float32) * 0.1
    b1 = jax.random.normal(kb1, (hidden,), dtype=jnp.float32) * 0.1
    w2 = jax.random.normal(kw2, (hidden, num_classes), dtype=jnp.float32) * 0.1
    b2 = jax.random.normal(kb2, (num_classes,), dtype=jnp.float32) * 0.1

    # One-time parameter prep (pad + bf16 cast), hoisted out of the call path.
    params = prepare_finetuner_params(w1, b1, w2, b2)
    params = jax.block_until_ready(params)
    w1p, b1p, w2p, b2p = params

    y_hat = finetuner_forward(x, w1p, b1p, w2p, b2p, num_classes=num_classes)
    y_hat = jax.block_until_ready(y_hat)

    # Pure-JAX reference with the same bf16-input / f32-accumulate recipe.
    xb = x.astype(jnp.bfloat16)
    w1b = w1.astype(jnp.bfloat16)
    w2b = w2.astype(jnp.bfloat16)
    h_ref = jnp.maximum(
        jnp.dot(xb, w1b, preferred_element_type=jnp.float32) + b1, 0.0)
    y_ref = jnp.dot(h_ref.astype(jnp.bfloat16), w2b,
                    preferred_element_type=jnp.float32) + b2

    assert y_hat.shape == (batch, num_classes)
    # Kernel logits are written back in bf16 -> compare at bf16 tolerance.
    assert jnp.allclose(y_hat, y_ref, atol=2e-2, rtol=2e-2)

    print("KERNEL_OK")
</pallas_src>

<mosaic_0001>
module attributes {stable_mosaic.version = 11 : i64} {
  func.func @finetuner_kernel(%arg0: i32, %arg1: memref<104x32xbf16, #tpu.memory_space<vmem>>, %arg2: memref<32x128xbf16, #tpu.memory_space<vmem>>, %arg3: memref<1x128xf32, #tpu.memory_space<vmem>>, %arg4: memref<128x128xbf16, #tpu.memory_space<vmem>>, %arg5: memref<1x128xf32, #tpu.memory_space<vmem>>, %arg6: memref<104x128xbf16, #tpu.memory_space<vmem>>) attributes {dimension_semantics = [#tpu.dimension_semantics<parallel>], iteration_bounds = array<i64: 2>, scalar_prefetch = 0 : i64, scratch_operands = 0 : i64, tpu.core_type = #tpu.core_type<tc>, window_params = [{transform_indices = @transform_0, window_bounds = array<i64: 104, 32>}, {pipeline_mode = #tpu.pipeline_mode<synchronous>, transform_indices = @transform_1, window_bounds = array<i64: 32, 128>}, {pipeline_mode = #tpu.pipeline_mode<synchronous>, transform_indices = @transform_2, window_bounds = array<i64: 1, 128>}, {pipeline_mode = #tpu.pipeline_mode<synchronous>, transform_indices = @transform_3, window_bounds = array<i64: 128, 128>}, {pipeline_mode = #tpu.pipeline_mode<synchronous>, transform_indices = @transform_4, window_bounds = array<i64: 1, 128>}, {transform_indices = @transform_5, window_bounds = array<i64: 104, 128>}]} {
    %c0 = arith.constant 0 : index
    %c0_0 = arith.constant 0 : index
    %0 = vector.load %arg1[%c0, %c0_0] : memref<104x32xbf16, #tpu.memory_space<vmem>>, vector<104x32xbf16>
    %c0_1 = arith.constant 0 : index
    %c0_2 = arith.constant 0 : index
    %1 = vector.load %arg2[%c0_1, %c0_2] : memref<32x128xbf16, #tpu.memory_space<vmem>>, vector<32x128xbf16>
    %cst = arith.constant dense<0.000000e+00> : vector<104x128xf32>
    %2 = tpu.matmul %0, %1, %cst {dimension_numbers = #tpu.dot_dimension_numbers<[1], [0], [0], [1], [0, 0, 1, 1], [], []>} : vector<104x32xbf16>, vector<32x128xbf16>, vector<104x128xf32> -> vector<104x128xf32>
    %c0_3 = arith.constant 0 : index
    %c0_4 = arith.constant 0 : index
    %3 = vector.load %arg3[%c0_3, %c0_4] : memref<1x128xf32, #tpu.memory_space<vmem>>, vector<1x128xf32>
    %4 = vector.broadcast %3 : vector<1x128xf32> to vector<104x128xf32>
    %5 = arith.addf %2, %4 : vector<104x128xf32>
    %cst_5 = arith.constant 0.000000e+00 : f32
    %6 = vector.broadcast %cst_5 : f32 to vector<104x128xf32>
    %7 = arith.maximumf %5, %6 : vector<104x128xf32>
    %8 = arith.truncf %7 : vector<104x128xf32> to vector<104x128xbf16>
    %c0_6 = arith.constant 0 : index
    %c0_7 = arith.constant 0 : index
    %9 = vector.load %arg4[%c0_6, %c0_7] : memref<128x128xbf16, #tpu.memory_space<vmem>>, vector<128x128xbf16>
    %cst_8 = arith.constant dense<0.000000e+00> : vector<104x128xf32>
    %10 = tpu.matmul %8, %9, %cst_8 {dimension_numbers = #tpu.dot_dimension_numbers<[1], [0], [0], [1], [0, 0, 1, 1], [], []>} : vector<104x128xbf16>, vector<128x128xbf16>, vector<104x128xf32> -> vector<104x128xf32>
    %c0_9 = arith.constant 0 : index
    %c0_10 = arith.constant 0 : index
    %11 = vector.load %arg5[%c0_9, %c0_10] : memref<1x128xf32, #tpu.memory_space<vmem>>, vector<1x128xf32>
    %12 = vector.broadcast %11 : vector<1x128xf32> to vector<104x128xf32>
    %13 = arith.addf %10, %12 : vector<104x128xf32>
    %14 = arith.truncf %13 : vector<104x128xf32> to vector<104x128xbf16>
    %c0_11 = arith.constant 0 : index
    %c0_12 = arith.constant 0 : index
    %15 = vector.load %arg6[%c0_11, %c0_12] : memref<104x128xbf16, #tpu.memory_space<vmem>>, vector<104x128xbf16>
    tpu.vector_store %arg6[%c0_11, %c0_12], %14 {strides = array<i32>} : memref<104x128xbf16, #tpu.memory_space<vmem>>, vector<104x128xbf16>,
    return
  }
  func.func @transform_0(%arg0: i32) -> (i32, i32) {
    %c0_i32 = arith.constant 0 : i32
    %c0_i32_0 = arith.constant 0 : i32
    return %arg0, %c0_i32 : i32, i32
  }
  func.func @transform_1(%arg0: i32) -> (i32, i32) {
    %c0_i32 = arith.constant 0 : i32
    %c0_i32_0 = arith.constant 0 : i32
    %c0_i32_1 = arith.constant 0 : i32
    return %c0_i32, %c0_i32_0 : i32, i32
  }
  func.func @transform_2(%arg0: i32) -> (i32, i32) {
    %c0_i32 = arith.constant 0 : i32
    %c0_i32_0 = arith.constant 0 : i32
    %c0_i32_1 = arith.constant 0 : i32
    return %c0_i32, %c0_i32_0 : i32, i32
  }
  func.func @transform_3(%arg0: i32) -> (i32, i32) {
    %c0_i32 = arith.constant 0 : i32
    %c0_i32_0 = arith.constant 0 : i32
    %c0_i32_1 = arith.constant 0 : i32
    return %c0_i32, %c0_i32_0 : i32, i32
  }
  func.func @transform_4(%arg0: i32) -> (i32, i32) {
    %c0_i32 = arith.constant 0 : i32
    %c0_i32_0 = arith.constant 0 : i32
    %c0_i32_1 = arith.constant 0 : i32
    return %c0_i32, %c0_i32_0 : i32, i32
  }
  func.func @transform_5(%arg0: i32) -> (i32, i32) {
    %c0_i32 = arith.constant 0 : i32
    %c0_i32_0 = arith.constant 0 : i32
    return %arg0, %c0_i32 : i32, i32
  }
}

</mosaic_0001>

<bundles_post_ra>
// kernel: finetuner_forward.1
= control target key start
LH: loop header
LB: loop body
LE: loop exit
PB: predicated region body
PF: predicated region fallthrough
CT: control target
= control target key end

     0   :  { %s988_s18 = smov 0   ;;  %s1134_s0 = inlined_call_operand.vmem [shape: bf16[208,32], index: 0, kind: input, shape index: {}]   ;;  %s1135_s1 = inlined_call_operand.vmem [shape: bf16[32,128], index: 1, kind: input, shape index: {}]   ;;  %s1136_s2 = inlined_call_operand.vmem [shape: f32[1,128], index: 2, kind: input, shape index: {}]   ;;  %s1137_s3 = inlined_call_operand.vmem [shape: bf16[128,128], index: 3, kind: input, shape index: {}]   ;;  %s1138_s4 = inlined_call_operand.vmem [shape: f32[1,128], index: 4, kind: input, shape index: {}]   ;;  %s1139_s5 = inlined_call_operand.vmem [shape: bf16[208,128], index: 5, kind: output, shape index: {}]  }
   0x1 LB: > { %s709_s19 = sadd.s32 4294967295, %s954_s18   ;;  %p713_p0 = scmp.ge.s32.totalorder %s954_s18, 1  ;;  %s954_s18 = sphi %s988_s18, %s15_s18  }
   0x2   : > { %p188_p1 = scmp.lt.s32.totalorder %s954_s18, 3 }
   0x4   : > { %p189_p2 = pnand %p713_p0, %p188_p1 }
   0x5   : > { %v931_v0 = vld [vmem:[%s1135_s1] sm:$0xff] (!%p189_p2)   ;;  %v956_v1 = vmov (!%p189_p2), 0.0   ;;  %v932_v2 = vld [vmem:[%s1135_s1 + $0x8] sm:$0xff] (!%p189_p2)   ;;  %vm957_vm0 = vmmov (!%p189_p2), 0   ;;  %s216_s24 = smul.u32 (!%p189_p2), 13, %s709_s19  ;;  %vm298_vm1 = vcmask (!%p189_p2), 261120  }
   0x6   : > { %192 = sbr.rel (%p189_p2) target bundleno = 502 (0x1f6), region = 40  ;;  %829 = vmatprep.subr.bf16.mxu0 (!%p189_p2), %v956_v1  ;;  %905 = vmatprep.subr.bf16.mxu1 (!%p189_p2), %v956_v1  ;;  %v940_v3 = vld [vmem:[%s1137_s3] sm:$0xff] (!%p189_p2)   ;;  %v941_v4 = vld [vmem:[%s1137_s3 + $0x8] sm:$0xff] (!%p189_p2)   ;;  %v942_v6 = vld [vmem:[%s1137_s3 + $0x10] sm:$0xff] (!%p189_p2)  }
   0x7   : > { %830 = vmatpush3.bf16.msra.mxu0 (!%p189_p2), %v931_v0  ;;  %833 = vmatprep.mubr.msk.bf16.mxu0 (!%p189_p2), %vm957_vm0, %v956_v1  ;;  %p217_p3 = scmp.lt.s32.totalorder (!%p189_p2), %s216_s24, 25  ;;  %v943_v8 = vld [vmem:[%s1137_s3 + $0x18] sm:$0xff] (!%p189_p2)   ;;  %v944_v9 = vld [vmem:[%s1137_s3 + $0x20] sm:$0xff] (!%p189_p2)   ;;  %v945_v11 = vld [vmem:[%s1137_s3 + $0x28] sm:$0xff] (!%p189_p2)  }
   0x8   : > { %831 = vmatprep.subr.bf16.mxu0 (!%p189_p2), %v956_v1  ;;  %881 = vmatprep.mubr.msk.bf16.mxu1 (!%p189_p2), %vm957_vm0, %v956_v1  ;;  %v946_v16 = vld [vmem:[%s1137_s3 + $0x30] sm:$0xff] (!%p189_p2)   ;;  %v947_v17 = vld [vmem:[%s1137_s3 + $0x38] sm:$0xff] (!%p189_p2)   ;;  %v1089_v18 = vld [vmem:[%s1136_s2] ss:$0 sm:$0xff] (!%p189_p2) }
   0x9   : > { %913 = vmatpush3.bf16.msra.mxu1 (!%p189_p2), %v940_v3 }
   0xa   : > { %906 = vmatprep.subr.bf16.mxu1 (!%p189_p2), %v956_v1 }
   0xb   : > { %832 = vmatpush3.bf16.msra.mxu0 (!%p189_p2), %v932_v2 }
   0xc   : > { %861 = vmatprep.subr.bf16.mxu0 (!%p189_p2), %v956_v1 }
   0xd   : > { %s1141_s24 = smov (!%p217_p3, %s216_s24), 25  ;;  %914 = vmatpush3.bf16.msra.mxu1 %v941_v4 }
   0xe   : > { %s714_s29 = sshll.u32 %s1141_s24, 2  ;;  %907 = vmatprep.subr.bf16.mxu1 %v956_v1 }
   0xf   : > { %s1025_s7 = scalar_lea.vmem %s1134_s0, %s714_s29  ;;  %s1122_s28 = scalar_lea.vmem %s1139_s5, %s714_s29 }
  0x10   : > { %v933_v5 = vld [vmem:[%s1025_s7] sm:$0xff]   ;;  %v934_v7 = vld [vmem:[%s1025_s7 + $0x8] sm:$0xff]   ;;  %v935_v10 = vld [vmem:[%s1025_s7 + $0x10] sm:$0xff]  }
  0x11   : > { %834 = vmatmul.mubr.msk.bf16.vlgmr.msra.gmra.mrb[0].mxu0 %vm298_vm1, %v933_v5  ;;  %915 = vmatpush3.bf16.msra.mxu1 %v942_v6  ;;  %v936_v12 = vld [vmem:[%s1025_s7 + $0x18] sm:$0xff]   ;;  %v937_v13 = vld [vmem:[%s1025_s7 + $0x20] sm:$0xff]   ;;  %v938_v14 = vld [vmem:[%s1025_s7 + $0x28] sm:$0xff]  }
  0x12   : > { %837 = vmatprep.mubr.msk.bf16.mxu0 %vm957_vm0, %v956_v1  ;;  %862 = vmatpush3.bf16.msra.mxu0 %v940_v3  ;;  %v939_v15 = vld [vmem:[%s1025_s7 + $0x30] ss:$0 sps:$4 sm:$0xff]  }
  0x13   : > { %863 = vmatprep.subr.bf16.mxu0 %v956_v1  ;;  %908 = vmatprep.subr.bf16.mxu1 %v956_v1 }
  0x15   : > { %916 = vmatpush3.bf16.msra.mxu1 %v943_v8 }
  0x16   : > { %864 = vmatpush3.bf16.msra.mxu0 %v941_v4  ;;  %909 = vmatprep.subr.bf16.mxu1 %v956_v1 }
  0x17   : > { %865 = vmatprep.subr.bf16.mxu0 %v956_v1 }
  0x19   : > { %838 = vmatmul.mubr.msk.bf16.gmra.mrb[4].mxu0 %vm298_vm1, %v934_v7  ;;  %917 = vmatpush3.bf16.msra.mxu1 %v944_v9 }
  0x1a   : > { %841 = vmatprep.mubr.msk.bf16.mxu0 %vm957_vm0, %v956_v1  ;;  %866 = vmatpush3.bf16.msra.mxu0 %v942_v6 }
  0x1b   : > { %867 = vmatprep.subr.bf16.mxu0 %v956_v1  ;;  %910 = vmatprep.subr.bf16.mxu1 %v956_v1 }
  0x1d   : > { %918 = vmatpush3.bf16.msra.mxu1 %v945_v11 }
  0x1e   : > { %868 = vmatpush3.bf16.msra.mxu0 %v943_v8  ;;  %911 = vmatprep.subr.bf16.mxu1 %v956_v1 }
  0x1f   : > { %869 = vmatprep.subr.bf16.mxu0 %v956_v1 }
  0x21   : > { %842 = vmatmul.mubr.msk.bf16.gmra.mrb[8].mxu0 %vm298_vm1, %v935_v10  ;;  %919 = vmatpush3.bf16.msra.mxu1 %v946_v16 }
  0x22   : > { %845 = vmatprep.mubr.msk.bf16.mxu0 %vm957_vm0, %v956_v1  ;;  %870 = vmatpush3.bf16.msra.mxu0 %v944_v9 }
  0x23   : > { %871 = vmatprep.subr.bf16.mxu0 %v956_v1  ;;  %912 = vmatprep.subr.bf16.mxu1 %v956_v1 }
  0x25   : > { %920 = vmatpush3.bf16.msra.mxu1 %v947_v17 }
  0x26   : > { %872 = vmatpush3.bf16.msra.mxu0 %v945_v11 }
  0x27   : > { %873 = vmatprep.subr.bf16.mxu0 %v956_v1 }
  0x29   : > { %846 = vmatmul.mubr.msk.bf16.gmra.mrb[12].mxu0 %vm298_vm1, %v936_v12 }
  0x2a   : > { %849 = vmatprep.mubr.msk.bf16.mxu0 %vm957_vm0, %v956_v1  ;;  %874 = vmatpush3.bf16.msra.mxu0 %v946_v16 }
  0x2b   : > { %875 = vmatprep.subr.bf16.mxu0 %v956_v1 }
  0x2e   : > { %876 = vmatpush3.bf16.msra.mxu0 %v947_v17  ;;  %v733_v17 = vld [vmem:[%s1138_s4] ss:$0 sm:$0xff] }
  0x31   : > { %850 = vmatmul.mubr.msk.bf16.gmra.mrb[16].mxu0 %vm298_vm1, %v937_v13 }
  0x32   : > { %853 = vmatprep.mubr.msk.bf16.mxu0 %vm957_vm0, %v956_v1 }
  0x39   : > { %854 = vmatmul.mubr.msk.bf16.gmra.mrb[20].mxu0 %vm298_vm1, %v938_v14 }
  0x3a   : > { %857 = vmatprep.mubr.msk.bf16.mxu0 %vm957_vm0, %v956_v1 }
  0x41   : > { %858 = vmatmul.mubr.msk.bf16.gmra.mrb[24].mxu0 %vm298_vm1, %v939_v15 }
  0x42   : > { %877 = vmatprep.mubr.msk.bf16.mxu0 %vm957_vm0, %v956_v1 }
  0xe4   : > { %v354_v19 = vpop.f32.mrb[0].mxu0 }
  0xe5   : > { %v355_v20 = vadd.f32 %v1089_v18, %v354_v19  ;;  %v835_v21 = vpop.f32.mrb[1].mxu0 }
  0xe6   : > { %v357_v22 = vpop.f32.mrb[2].mxu0 }
  0xe7   : > { %v358_v23 = vadd.f32 %v1089_v18, %v357_v22  ;;  %v836_v24 = vpop.f32.mrb[3].mxu0  ;;  %v408_v25 = vmax.f32 %v355_v20, 0.0 }
  0xe9   : > { %v409_v26 = vmax.f32 %v358_v23, 0.0 }
  0xeb   : > { %v421_v27 = vpack.c.bf16 %v409_v26, %v408_v25 }
  0xec   : > { %v362_v28 = vpop.f32.mrb[4].mxu0 }
  0xed   : > { %v363_v29 = vadd.f32 %v1089_v18, %v362_v28  ;;  %v839_v30 = vpop.f32.mrb[5].mxu0  ;;  %878 = vmatmul.mubr.bf16.vlgmr.msra.gmra.mrb[28].mxu0 %v421_v27 }
  0xee   : > { %v365_v31 = vpop.f32.mrb[6].mxu0 }
  0xef   : > { %v366_v32 = vadd.f32 %v1089_v18, %v365_v31  ;;  %v840_v33 = vpop.f32.mrb[7].mxu0  ;;  %v410_v34 = vmax.f32 %v363_v29, 0.0 }
  0xf1   : > { %v411_v35 = vmax.f32 %v366_v32, 0.0 }
  0xf3   : > { %v422_v36 = vpack.c.bf16 %v411_v35, %v410_v34 }
  0xf4   : > { %v370_v37 = vpop.f32.mrb[8].mxu0 }
  0xf5   : > { %v371_v38 = vadd.f32 %v1089_v18, %v370_v37  ;;  %v843_v39 = vpop.f32.mrb[9].mxu0  ;;  %882 = vmatmul.mubr.bf16.vlgmr.msra.gmra.mrb[0].mxu1 %v422_v36 }
  0xf6   : > { %v373_v40 = vpop.f32.mrb[10].mxu0  ;;  %885 = vmatprep.mubr.msk.bf16.mxu1 %vm957_vm0, %v956_v1 }
  0xf7   : > { %v374_v41 = vadd.f32 %v1089_v18, %v373_v40  ;;  %v844_v42 = vpop.f32.mrb[11].mxu0  ;;  %v412_v43 = vmax.f32 %v371_v38, 0.0 }
  0xf9   : > { %v413_v44 = vmax.f32 %v374_v41, 0.0 }
  0xfb   : > { %v423_v45 = vpack.c.bf16 %v413_v44, %v412_v43 }
  0xfc   : > { %v378_v46 = vpop.f32.mrb[12].mxu0 }
  0xfd   : > { %v379_v47 = vadd.f32 %v1089_v18, %v378_v46  ;;  %v847_v48 = vpop.f32.mrb[13].mxu0  ;;  %886 = vmatmul.mubr.bf16.gmra.mrb[4].mxu1 %v423_v45 }
  0xfe   : > { %v381_v49 = vpop.f32.mrb[14].mxu0  ;;  %889 = vmatprep.mubr.msk.bf16.mxu1 %vm957_vm0, %v956_v1 }
  0xff   : > { %v382_v50 = vadd.f32 %v1089_v18, %v381_v49  ;;  %v848_v51 = vpop.f32.mrb[15].mxu0  ;;  %v414_v52 = vmax.f32 %v379_v47, 0.0 }
 0x101   : > { %v415_v53 = vmax.f32 %v382_v50, 0.0 }
 0x103   : > { %v424_v54 = vpack.c.bf16 %v415_v53, %v414_v52 }
 0x104   : > { %v386_v55 = vpop.f32.mrb[16].mxu0 }
 0x105   : > { %v387_v56 = vadd.f32 %v1089_v18, %v386_v55  ;;  %v851_v57 = vpop.f32.mrb[17].mxu0  ;;  %890 = vmatmul.mubr.bf16.gmra.mrb[8].mxu1 %v424_v54 }
 0x106   : > { %v389_v58 = vpop.f32.mrb[18].mxu0  ;;  %893 = vmatprep.mubr.msk.bf16.mxu1 %vm957_vm0, %v956_v1 }
 0x107   : > { %v390_v59 = vadd.f32 %v1089_v18, %v389_v58  ;;  %v852_v60 = vpop.f32.mrb[19].mxu0  ;;  %v416_v61 = vmax.f32 %v387_v56, 0.0 }
 0x109   : > { %v417_v62 = vmax.f32 %v390_v59, 0.0 }
 0x10b   : > { %v425_v63 = vpack.c.bf16 %v417_v62, %v416_v61 }
 0x10c   : > { %v394_v0 = vpop.f32.mrb[20].mxu0 }
 0x10d   : > { %v395_v2 = vadd.f32 %v1089_v18, %v394_v0  ;;  %v855_v3 = vpop.f32.mrb[21].mxu0  ;;  %894 = vmatmul.mubr.bf16.gmra.mrb[12].mxu1 %v425_v63 }
 0x10e   : > { %v397_v4 = vpop.f32.mrb[22].mxu0  ;;  %897 = vmatprep.mubr.msk.bf16.mxu1 %vm957_vm0, %v956_v1 }
 0x10f   : > { %v398_v5 = vadd.f32 %v1089_v18, %v397_v4  ;;  %v856_v6 = vpop.f32.mrb[23].mxu0  ;;  %v418_v7 = vmax.f32 %v395_v2, 0.0 }
 0x111   : > { %v419_v8 = vmax.f32 %v398_v5, 0.0 }
 0x113   : > { %v426_v9 = vpack.c.bf16 %v419_v8, %v418_v7 }
 0x114   : > { %v402_v10 = vpop.f32.mrb[24].mxu0 }
 0x115   : > { %v403_v11 = vadd.f32 %v1089_v18, %v402_v10  ;;  %v859_v12 = vpop.f32.mrb[25].mxu0  ;;  %898 = vmatmul.mubr.bf16.gmra.mrb[16].mxu1 %v426_v9 }
 0x116   : > { %v405_v13 = vpop.f32.mrb[26].mxu0  ;;  %901 = vmatprep.mubr.msk.bf16.mxu1 %vm957_vm0, %v956_v1 }
 0x117   : > { %v420_v14 = vmax.f32 %v403_v11, 0.0  ;;  %v860_v15 = vpop.f32.mrb[27].mxu0 }
 0x119   : > { %v427_v16 = vpack.c.bf16 %v420_v14, %v420_v14 }
 0x11d   : > { %902 = vmatmul.mubr.bf16.gmra.mrb[20].mxu1 %v427_v16 }
 0x1c0   : > { %v533_v19 = vpop.f32.mrb[28].mxu0 }
 0x1c1   : > { %v879_v20 = vpop.f32.mrb[29].mxu0  ;;  %v534_v22 = vadd.f32 %v733_v17, %v533_v19 }
 0x1c2   : > { %v536_v21 = vpop.f32.mrb[30].mxu0 }
 0x1c3   : > { %v537_v18 = vadd.f32 %v733_v17, %v536_v21  ;;  %v880_v23 = vpop.f32.mrb[31].mxu0 }
 0x1c5   : > { %v773_v1 = vpack.c.bf16 %v537_v18, %v534_v22 }
 0x1c7   : > { %774 = vst [vmem:[%s1122_s28] sm:$0xff] %v773_v1  }
 0x1c8   : > { %v541_v24 = vpop.f32.mrb[0].mxu1 }
 0x1c9   : > { %v883_v25 = vpop.f32.mrb[1].mxu1  ;;  %v542_v27 = vadd.f32 %v733_v17, %v541_v24 }
 0x1ca   : > { %v544_v26 = vpop.f32.mrb[2].mxu1 }
 0x1cb   : > { %v545_v28 = vadd.f32 %v733_v17, %v544_v26  ;;  %v884_v29 = vpop.f32.mrb[3].mxu1 }
 0x1cd   : > { %v778_v30 = vpack.c.bf16 %v545_v28, %v542_v27 }
 0x1cf   : > { %800 = vst [vmem:[%s1122_s28 + $0x8] sm:$0xff] %v778_v30  }
 0x1d0   : > { %v549_v31 = vpop.f32.mrb[4].mxu1 }
 0x1d1   : > { %v887_v32 = vpop.f32.mrb[5].mxu1  ;;  %v550_v34 = vadd.f32 %v733_v17, %v549_v31 }
 0x1d2   : > { %v552_v33 = vpop.f32.mrb[6].mxu1 }
 0x1d3   : > { %v553_v35 = vadd.f32 %v733_v17, %v552_v33  ;;  %v888_v36 = vpop.f32.mrb[7].mxu1 }
 0x1d5   : > { %v783_v37 = vpack.c.bf16 %v553_v35, %v550_v34 }
 0x1d7   : > { %801 = vst [vmem:[%s1122_s28 + $0x10] sm:$0xff] %v783_v37  }
 0x1d8   : > { %v557_v38 = vpop.f32.mrb[8].mxu1 }
 0x1d9   : > { %v891_v39 = vpop.f32.mrb[9].mxu1  ;;  %v558_v41 = vadd.f32 %v733_v17, %v557_v38 }
 0x1da   : > { %v560_v40 = vpop.f32.mrb[10].mxu1 }
 0x1db   : > { %v561_v42 = vadd.f32 %v733_v17, %v560_v40  ;;  %v892_v43 = vpop.f32.mrb[11].mxu1 }
 0x1dd   : > { %v788_v44 = vpack.c.bf16 %v561_v42, %v558_v41 }
 0x1df   : > { %802 = vst [vmem:[%s1122_s28 + $0x18] sm:$0xff] %v788_v44  }
 0x1e0   : > { %v565_v45 = vpop.f32.mrb[12].mxu1 }
 0x1e1   : > { %v895_v46 = vpop.f32.mrb[13].mxu1  ;;  %v566_v48 = vadd.f32 %v733_v17, %v565_v45 }
 0x1e2   : > { %v568_v47 = vpop.f32.mrb[14].mxu1 }
 0x1e3   : > { %v569_v49 = vadd.f32 %v733_v17, %v568_v47  ;;  %v896_v50 = vpop.f32.mrb[15].mxu1 }
 0x1e5   : > { %v793_v51 = vpack.c.bf16 %v569_v49, %v566_v48 }
 0x1e7   : > { %803 = vst [vmem:[%s1122_s28 + $0x20] sm:$0xff] %v793_v51  }
 0x1e8   : > { %v573_v52 = vpop.f32.mrb[16].mxu1 }
 0x1e9   : > { %v899_v53 = vpop.f32.mrb[17].mxu1  ;;  %v574_v55 = vadd.f32 %v733_v17, %v573_v52 }
 0x1ea   : > { %v576_v54 = vpop.f32.mrb[18].mxu1 }
 0x1eb   : > { %v577_v56 = vadd.f32 %v733_v17, %v576_v54  ;;  %v900_v57 = vpop.f32.mrb[19].mxu1 }
 0x1ed   : > { %v798_v58 = vpack.c.bf16 %v577_v56, %v574_v55 }
 0x1ef   : > { %804 = vst [vmem:[%s1122_s28 + $0x28] sm:$0xff] %v798_v58  }
 0x1f0   : > { %v581_v59 = vpop.f32.mrb[20].mxu1 }
 0x1f1   : > { %v582_v60 = vadd.f32 %v733_v17, %v581_v59  ;;  %v903_v61 = vpop.f32.mrb[21].mxu1 }
 0x1f2   : > { %v584_v62 = vpop.f32.mrb[22].mxu1 }
 0x1f3   : > { %v769_v63 = vpack.c.bf16 %v582_v60, %v582_v60  ;;  %v904_v0 = vpop.f32.mrb[23].mxu1 }
 0x1f5   : > { %652 = vst [vmem:[%s1122_s28 + $0x30] sm:$0xf] %v769_v63 }
 0x1f6 PF: > { %s15_s18 = sadd.s32 1, %s954_s18  }
 0x1f7   : > { %p12_p4 = scmp.ge.s32.totalorder %s15_s18, 4  }
 0x1f9   :  { %14 = sbr.rel (!%p12_p4) target bundleno = 1 (0x1), region = 70 }

</bundles_post_ra>
